<compile_context>
chip_gen: v7x
topology: tpu7x:2x2x1
jax: 0.10.0
libtpu: 0.0.40
codegen_flags: <defaults>
</compile_context>

<pallas_src>
import functools

import jax
import jax.numpy as jnp
from jax import lax
from jax.experimental import pallas as pl
from jax.experimental.pallas import tpu as pltpu


def _softplus(x):
    # Numerically stable single-branch softplus: max(x,0) + log1p(exp(-|x|)).
    # (Same formula jax.nn.softplus uses; 2 EUP transcendentals per element.)
    return jnp.maximum(x, 0.0) + jnp.log1p(jnp.exp(-jnp.abs(x)))


def _round_up(n, m):
    return ((n + m - 1) // m) * m


def _regular_network_kernel(x_ref, w1_ref, b1_ref, w2t_ref, b2_ref, o_ref,
                            *, total_rows, pack, tile_rows, mask_tail):
    i = pl.program_id(0)

    # fc1 + relu on the MXU, f32 accumulation:
    #   (tile_rows, pack*C) @ (pack*C, pack*hh) -> (tile_rows, pack*hh)
    # W1 is block-diagonal, so each 128-lane x row carries `pack` independent
    # batch rows (no lane padding for C=32).
    h = jnp.dot(x_ref[...], w1_ref[...], preferred_element_type=jnp.float32)
    h = jnp.maximum(h + b1_ref[...], 0.0)

    # fc2 transposed so the packed-row axis lands on lanes (lane-dense z):
    #   (pack, pack*hh) x (tile_rows, pack*hh) contracting pack*hh
    #   -> (pack, tile_rows); z[k, r] = fc2 of batch row (i*tile_rows + r)*pack + k
    z = lax.dot_general(
        w2t_ref[...], h,
        dimension_numbers=(((1,), (1,)), ((), ())),
        preferred_element_type=jnp.float32,
    )
    z = z + b2_ref[0]            # scalar bias broadcast from SMEM
    sp = _softplus(z)            # (pack, tile_rows), lane-dense

    def _store(masked):
        if masked:
            sub = lax.broadcasted_iota(jnp.int32, sp.shape, 0)    # slot in packed row
            lane = lax.broadcasted_iota(jnp.int32, sp.shape, 1)   # packed row in tile
            batch_idx = (i * tile_rows + lane) * pack + sub
            # Select (NOT multiply): out-of-range rows hold unspecified VMEM
            # contents (possibly Inf/NaN) which must be dropped, not scaled.
            vals = jnp.where(batch_idx < total_rows, sp, 0.0)
        else:
            vals = sp
        # One lane-dense (1,1,128) store of this tile's partial sum.
        o_ref[...] = jnp.full((1, 1, 128), jnp.sum(vals), dtype=jnp.float32)

    if mask_tail:
        last = pl.num_programs(0) - 1

        @pl.when(i != last)
        def _():
            _store(False)

        @pl.when(i == last)
        def _():
            _store(True)
    else:
        _store(False)


def regular_network_forward(x, w1, b1, w2, b2, *, tile_b=32768):
    """x: (..., C); w1: (C, hh); b1: (hh,); w2: (hh, 1); b2: (1,).

    Returns the scalar mean(softplus(fc2(relu(fc1(x))))) as f32.
    tile_b is the batch-tile size in rows; sweep ~8192-32768 for large B.
    """
    C, hh = w1.shape
    x2d = x.reshape(-1, C)
    B = x2d.shape[0]

    # Compute dtype: keep bf16 only if x already arrives as bf16 (halves the x
    # stream); otherwise stay f32.  Never down-cast f32 -> bf16 here -- a
    # standalone astype is an extra HBM pass that costs more than it saves.
    cdt = jnp.bfloat16 if x2d.dtype == jnp.bfloat16 else jnp.float32
    if x2d.dtype != cdt:
        x2d = x2d.astype(cdt)

    # Lane packing: `pack` batch rows per 128-lane row (falls back to 1 when C
    # does not divide 128, e.g. the Flatten_FTF variant with C = in_channels**2).
    pack = 128 // C if (C <= 128 and 128 % C == 0) else 1
    B_pad = _round_up(B, pack)
    if B_pad != B:
        x2d = jnp.pad(x2d, ((0, B_pad - B), (0, 0)))   # padded rows masked in-kernel
    R = B_pad // pack                                   # packed rows
    x_packed = x2d.reshape(R, pack * C)

    # Block-diagonal weights so the packed matmul equals `pack` independent fc1/fc2.
    eye = jnp.eye(pack, dtype=jnp.float32)
    w1_blk = jnp.kron(eye, w1.astype(jnp.float32)).astype(cdt)            # (pack*C, pack*hh)
    b1_blk = jnp.tile(b1.reshape(1, hh).astype(jnp.float32), (1, pack))   # (1, pack*hh)
    w2t_blk = jnp.kron(eye, w2.reshape(1, hh).astype(jnp.float32))        # (pack, pack*hh)
    b2_s = b2.reshape(1).astype(jnp.float32)

    # Batch tile: large enough (MiB-scale x per step) to amortize the ~0.35 us
    # per-grid-step pipeline overhead; sublane-aligned (8 for f32, 16 for bf16).
    sublane = 8 if jnp.dtype(cdt).itemsize == 4 else 16
    tile_rows = _round_up(max(1, min(tile_b // pack, R)), sublane)
    num_tiles = pl.cdiv(R, tile_rows)
    mask_tail = (num_tiles * tile_rows * pack) != B

    kernel = functools.partial(
        _regular_network_kernel,
        total_rows=B, pack=pack, tile_rows=tile_rows, mask_tail=mask_tail)

    partials = pl.pallas_call(
        kernel,
        out_shape=jax.ShapeDtypeStruct((num_tiles, 1, 128), jnp.float32),
        grid_spec=pltpu.PrefetchScalarGridSpec(
            num_scalar_prefetch=0,
            grid=(num_tiles,),
            in_specs=[
                pl.BlockSpec((tile_rows, pack * C), lambda i: (i, 0)),   # x: only O(B) stream
                pl.BlockSpec((pack * C, pack * hh), lambda i: (0, 0)),   # W1 block-diag, resident
                pl.BlockSpec((1, pack * hh), lambda i: (0, 0)),          # b1, resident
                pl.BlockSpec((pack, pack * hh), lambda i: (0, 0)),       # W2^T block-diag, resident
                pl.BlockSpec(memory_space=pltpu.MemorySpace.SMEM),       # b2 scalar
            ],
            out_specs=pl.BlockSpec((1, 1, 128), lambda i: (i, 0, 0)),    # per-tile partial sum
        ),
        compiler_params=pltpu.CompilerParams(
            # Tiles are independent (each writes its own partial sum), so the
            # batch axis is "parallel": on v7x megacore splits the stream across
            # both TensorCores; on v5e/v6e this is equivalent to sequential.
            dimension_semantics=("parallel",),
            # Allow MiB-scale double-buffered x tiles past the 16/32 MiB scoped
            # defaults while staying well under v7x's 64 MiB physical VMEM.
            vmem_limit_bytes=40 * 1024 * 1024,
        ),
    )(x_packed, w1_blk, b1_blk, w2t_blk, b2_s)

    # Tiny final reduction over the num_tiles per-tile partial sums.
    return jnp.sum(partials[:, 0, 0]) / jnp.float32(B)


def _reference(x, w1, b1, w2, b2):
    x2d = x.reshape(-1, w1.shape[0]).astype(jnp.float32)
    h = jnp.maximum(x2d @ w1 + b1[None, :], 0.0)
    z = h @ w2 + b2[None, :]
    return jnp.mean(jax.nn.softplus(z))


if __name__ == "__main__":
    # RegularNetwork(in_channels=32, hh=32, regular_type='MLP')
    C, HH = 32, 32

    key = jax.random.PRNGKey(0)
    kx, k1, k2, k3, k4 = jax.random.split(key, 5)

    # Deterministic PyTorch-like init: U(-1/sqrt(fan_in), 1/sqrt(fan_in))
    bound1 = 1.0 / (C ** 0.5)
    w1 = jax.random.uniform(k1, (C, HH), jnp.float32, -bound1, bound1)
    b1 = jax.random.uniform(k2, (HH,), jnp.float32, -bound1, bound1)
    bound2 = 1.0 / (HH ** 0.5)
    w2 = jax.random.uniform(k3, (HH, 1), jnp.float32, -bound2, bound2)
    b2 = jax.random.uniform(k4, (1,), jnp.float32, -bound2, bound2)

    # Small case: whole batch in one tile (grid=(1,)), pack=4 lane packing.
    B = 16
    x = jax.random.normal(kx, (B, C), dtype=jnp.float32)
    out = jax.block_until_ready(regular_network_forward(x, w1, b1, w2, b2))
    ref = _reference(x, w1, b1, w2, b2)
    assert jnp.allclose(out, ref, atol=1e-5, rtol=1e-5), (out, ref)

    # B not divisible by the pack factor (zero-padded rows masked in-kernel).
    xb = jax.random.normal(kx, (13, C), dtype=jnp.float32)
    out2 = jax.block_until_ready(regular_network_forward(xb, w1, b1, w2, b2))
    ref2 = _reference(xb, w1, b1, w2, b2)
    assert jnp.allclose(out2, ref2, atol=1e-5, rtol=1e-5), (out2, ref2)

    # Multiple grid steps: per-tile partial sums + masked tail tile.
    xc = jax.random.normal(kx, (40, C), dtype=jnp.float32)
    out3 = jax.block_until_ready(
        regular_network_forward(xc, w1, b1, w2, b2, tile_b=32))
    ref3 = _reference(xc, w1, b1, w2, b2)
    assert jnp.allclose(out3, ref3, atol=1e-5, rtol=1e-5), (out3, ref3)

    print("KERNEL_OK")
</pallas_src>

<mosaic_0001>
module attributes {stable_mosaic.version = 11 : i64} {
  func.func @_regular_network_kernel(%arg0: i32, %arg1: memref<8x128xf32, #tpu.memory_space<vmem>>, %arg2: memref<128x128xf32, #tpu.memory_space<vmem>>, %arg3: memref<1x128xf32, #tpu.memory_space<vmem>>, %arg4: memref<4x128xf32, #tpu.memory_space<vmem>>, %arg5: memref<1xf32, #tpu.memory_space<smem>>, %arg6: memref<1x1x128xf32, #tpu.memory_space<vmem>>) attributes {dimension_semantics = [#tpu.dimension_semantics<parallel>], iteration_bounds = array<i64: 1>, scalar_prefetch = 0 : i64, scratch_operands = 0 : i64, tpu.core_type = #tpu.core_type<tc>, window_params = [{transform_indices = @transform_0, window_bounds = array<i64: 8, 128>}, {pipeline_mode = #tpu.pipeline_mode<synchronous>, transform_indices = @transform_1, window_bounds = array<i64: 128, 128>}, {pipeline_mode = #tpu.pipeline_mode<synchronous>, transform_indices = @transform_2, window_bounds = array<i64: 1, 128>}, {pipeline_mode = #tpu.pipeline_mode<synchronous>, transform_indices = @transform_3, window_bounds = array<i64: 4, 128>}, {transform_indices = @transform_4, window_bounds = array<i64: 1>}, {transform_indices = @transform_5, window_bounds = array<i64: 1, 1, 128>}]} {
    %c0 = arith.constant 0 : index
    %c0_0 = arith.constant 0 : index
    %0 = vector.load %arg1[%c0, %c0_0] : memref<8x128xf32, #tpu.memory_space<vmem>>, vector<8x128xf32>
    %c0_1 = arith.constant 0 : index
    %c0_2 = arith.constant 0 : index
    %1 = vector.load %arg2[%c0_1, %c0_2] : memref<128x128xf32, #tpu.memory_space<vmem>>, vector<128x128xf32>
    %cst = arith.constant dense<0.000000e+00> : vector<8x128xf32>
    %2 = tpu.matmul %0, %1, %cst {dimension_numbers = #tpu.dot_dimension_numbers<[1], [0], [0], [1], [0, 0, 1, 1], [], []>} : vector<8x128xf32>, vector<128x128xf32>, vector<8x128xf32> -> vector<8x128xf32>
    %c0_3 = arith.constant 0 : index
    %c0_4 = arith.constant 0 : index
    %3 = vector.load %arg3[%c0_3, %c0_4] : memref<1x128xf32, #tpu.memory_space<vmem>>, vector<1x128xf32>
    %4 = vector.broadcast %3 : vector<1x128xf32> to vector<8x128xf32>
    %5 = arith.addf %2, %4 : vector<8x128xf32>
    %cst_5 = arith.constant 0.000000e+00 : f32
    %6 = vector.broadcast %cst_5 : f32 to vector<8x128xf32>
    %7 = arith.maximumf %5, %6 : vector<8x128xf32>
    %c0_6 = arith.constant 0 : index
    %c0_7 = arith.constant 0 : index
    %8 = vector.load %arg4[%c0_6, %c0_7] : memref<4x128xf32, #tpu.memory_space<vmem>>, vector<4x128xf32>
    %cst_8 = arith.constant dense<0.000000e+00> : vector<4x8xf32>
    %9 = tpu.matmul %8, %7, %cst_8 {dimension_numbers = #tpu.dot_dimension_numbers<[1], [1], [0], [0], [0, 0, 1, 0], [], []>} : vector<4x128xf32>, vector<8x128xf32>, vector<4x8xf32> -> vector<4x8xf32>
    %c0_9 = arith.constant 0 : index
    %10 = memref.load %arg5[%c0_9] : memref<1xf32, #tpu.memory_space<smem>>
    %11 = vector.broadcast %10 : f32 to vector<4x8xf32>
    %12 = arith.addf %9, %11 : vector<4x8xf32>
    %cst_10 = arith.constant 0.000000e+00 : f32
    %13 = vector.broadcast %cst_10 : f32 to vector<4x8xf32>
    %14 = arith.maximumf %12, %13 : vector<4x8xf32>
    %15 = math.absf %12 : vector<4x8xf32>
    %cst_11 = arith.constant 0.000000e+00 : f32
    %16 = vector.broadcast %cst_11 : f32 to vector<4x8xf32>
    %17 = arith.subf %16, %15 : vector<4x8xf32>
    %18 = math.exp %17 : vector<4x8xf32>
    %19 = math.log1p %18 : vector<4x8xf32>
    %20 = arith.addf %14, %19 : vector<4x8xf32>
    %c0_i32 = arith.constant 0 : i32
    %21 = arith.cmpi ne, %arg0, %c0_i32 : i32
    %22 = arith.extui %21 : i1 to i32
    %c0_i32_12 = arith.constant 0 : i32
    %23 = arith.cmpi ne, %22, %c0_i32_12 : i32
    scf.if %23 {
      %27 = vector.shape_cast %20 : vector<4x8xf32> to vector<1x4x8xf32>
      %cst_15 = arith.constant dense<0.000000e+00> : vector<1xf32>
      %28 = vector.multi_reduction <add>, %27, %cst_15 [1, 2] : vector<1x4x8xf32> to vector<1xf32>
      %29 = vector.shape_cast %28 : vector<1xf32> to vector<1x1x1xf32>
      %30 = vector.extract %29[0, 0, 0] : f32 from vector<1x1x1xf32>
      %31 = vector.broadcast %30 : f32 to vector<1x1x128xf32>
      %c0_16 = arith.constant 0 : index
      %c0_17 = arith.constant 0 : index
      %c0_18 = arith.constant 0 : index
      %32 = vector.load %arg6[%c0_16, %c0_17, %c0_18] : memref<1x1x128xf32, #tpu.memory_space<vmem>>, vector<1x1x128xf32>
      tpu.vector_store %arg6[%c0_16, %c0_17, %c0_18], %31 {strides = array<i32>} : memref<1x1x128xf32, #tpu.memory_space<vmem>>, vector<1x1x128xf32>,
    } else {
    }
    %c0_i32_13 = arith.constant 0 : i32
    %24 = arith.cmpi eq, %arg0, %c0_i32_13 : i32
    %25 = arith.extui %24 : i1 to i32
    %c0_i32_14 = arith.constant 0 : i32
    %26 = arith.cmpi ne, %25, %c0_i32_14 : i32
    scf.if %26 {
      %27 = tpu.iota {dimensions = array<i32: 0>} : vector<4x8xi32>
      %28 = tpu.iota {dimensions = array<i32: 1>} : vector<4x8xi32>
      %c8_i32 = arith.constant 8 : i32
      %29 = arith.muli %arg0, %c8_i32 : i32
      %30 = vector.broadcast %29 : i32 to vector<4x8xi32>
      %31 = arith.addi %30, %28 : vector<4x8xi32>
      %c4_i32 = arith.constant 4 : i32
      %32 = vector.broadcast %c4_i32 : i32 to vector<4x8xi32>
      %33 = arith.muli %31, %32 : vector<4x8xi32>
      %34 = arith.addi %33, %27 : vector<4x8xi32>
      %c16_i32 = arith.constant 16 : i32
      %35 = vector.broadcast %c16_i32 : i32 to vector<4x8xi32>
      %36 = arith.cmpi slt, %34, %35 : vector<4x8xi32>
      %cst_15 = arith.constant 0.000000e+00 : f32
      %37 = vector.broadcast %cst_15 : f32 to vector<4x8xf32>
      %38 = arith.select %36, %20, %37 : vector<4x8xi1>, vector<4x8xf32>
      %39 = vector.shape_cast %38 : vector<4x8xf32> to vector<1x4x8xf32>
      %cst_16 = arith.constant dense<0.000000e+00> : vector<1xf32>
      %40 = vector.multi_reduction <add>, %39, %cst_16 [1, 2] : vector<1x4x8xf32> to vector<1xf32>
      %41 = vector.shape_cast %40 : vector<1xf32> to vector<1x1x1xf32>
      %42 = vector.extract %41[0, 0, 0] : f32 from vector<1x1x1xf32>
      %43 = vector.broadcast %42 : f32 to vector<1x1x128xf32>
      %c0_17 = arith.constant 0 : index
      %c0_18 = arith.constant 0 : index
      %c0_19 = arith.constant 0 : index
      %44 = vector.load %arg6[%c0_17, %c0_18, %c0_19] : memref<1x1x128xf32, #tpu.memory_space<vmem>>, vector<1x1x128xf32>
      tpu.vector_store %arg6[%c0_17, %c0_18, %c0_19], %43 {strides = array<i32>} : memref<1x1x128xf32, #tpu.memory_space<vmem>>, vector<1x1x128xf32>,
    } else {
    }
    return
  }
  func.func @transform_0(%arg0: i32) -> (i32, i32) {
    %c0_i32 = arith.constant 0 : i32
    %c0_i32_0 = arith.constant 0 : i32
    return %arg0, %c0_i32 : i32, i32
  }
  func.func @transform_1(%arg0: i32) -> (i32, i32) {
    %c0_i32 = arith.constant 0 : i32
    %c0_i32_0 = arith.constant 0 : i32
    %c0_i32_1 = arith.constant 0 : i32
    return %c0_i32, %c0_i32_0 : i32, i32
  }
  func.func @transform_2(%arg0: i32) -> (i32, i32) {
    %c0_i32 = arith.constant 0 : i32
    %c0_i32_0 = arith.constant 0 : i32
    %c0_i32_1 = arith.constant 0 : i32
    return %c0_i32, %c0_i32_0 : i32, i32
  }
  func.func @transform_3(%arg0: i32) -> (i32, i32) {
    %c0_i32 = arith.constant 0 : i32
    %c0_i32_0 = arith.constant 0 : i32
    %c0_i32_1 = arith.constant 0 : i32
    return %c0_i32, %c0_i32_0 : i32, i32
  }
  func.func @transform_4(%arg0: i32) -> i32 {
    %c0_i32 = arith.constant 0 : i32
    %c0_i32_0 = arith.constant 0 : i32
    return %c0_i32 : i32
  }
  func.func @transform_5(%arg0: i32) -> (i32, i32, i32) {
    %c0_i32 = arith.constant 0 : i32
    %c0_i32_0 = arith.constant 0 : i32
    %c0_i32_1 = arith.constant 0 : i32
    return %arg0, %c0_i32, %c0_i32_0 : i32, i32, i32
  }
}

</mosaic_0001>

<bundles_post_ra>
// kernel: tpu_custom_call.1
= control target key start
LH: loop header
LB: loop body
LE: loop exit
PB: predicated region body
PF: predicated region fallthrough
CT: control target
= control target key end

     0   :  { %11 = vsyncpa [#allocation4], 0  ;;  %s551_s0 = inlined_call_operand.hbm [shape: f32[4,128], index: 0, kind: input, shape index: {}]   ;;  %s552_s1 = inlined_call_operand.hbm [shape: f32[128,128], index: 1, kind: input, shape index: {}]   ;;  %s553_s2 = inlined_call_operand.vmem [shape: f32[1,128], index: 2, kind: input, shape index: {}]   ;;  %s554_s3 = inlined_call_operand.vmem [shape: f32[4,128], index: 3, kind: input, shape index: {}]   ;;  %s555_s4 = inlined_call_operand.<no memory space> [shape: f32[1], index: 4, kind: input, shape index: {}]   ;;  %s556_s5 = inlined_call_operand.hbm [shape: f32[1,1,128], index: 5, kind: output, shape index: {}]  }
   0x1   :  { %12 = vsyncpa [#allocation7], 0 }
   0x2   :  { %13 = vsyncpa [#allocation5], 0 }
   0x3   :  { %18 = vsyncadd [#allocation4], 64  ;;  %s466_s18 = smov [#allocation3]   ;;  %s394_s22 = scalar_lea.hbm %s551_s0, 64 }
   0x4   :  { %s19_s19 = sshll.u32 %s466_s18, 4  ;;  %p395_p0 = scmp.ne.s32.totalorder %s551_s0, %s394_s22  ;;  %s20_s19 = int_to_ptr.vmem [resolvable:$true] %s19_s19 }
   0x5   :  { %p398_p1 = scmp.lt.u32.totalorder %s394_s22, %s551_s0 }
   0x7   :  { %p400_p2 = pnand %p398_p1, %p395_p0 }
   0x9   :  { %403 = shalt.err (!%p400_p2)
}
   0xa   :  { %s404_s27 = scalar_lea.vmem %s20_s19, 64  ;;  %s408_s28 = scalar_lea.vmem %s20_s19, 128 }
   0xb   :  { %p405_p3 = scmp.ne.s32.totalorder %s20_s19, %s404_s27  ;;  %p409_p4 = scmp.lt.s32.totalorder %s20_s19, %s20_s19 }
   0xc   :  { %p410_p5 = scmp.lt.s32.totalorder %s408_s28, %s404_s27 }
   0xe   :  { %p411_p6 = por %p410_p5, %p409_p4 }
  0x10   :  { %p412_p7 = pnand %p411_p6, %p405_p3 }
  0x12   :  { %415 = shalt.err (!%p412_p7)
}
  0x13   :  { %s467_s29 = smov 64   ;;  %s468_s30 = smov 4  }
  0x14   :  { %25 = dma.hbm_to_vmem [thread:$0]  %s551_s0, 64, %s20_s19, [#allocation4], %s467_s29, %s467_s29, %s468_s30  }
  0x15   :  { %s469_s8 = smov [#allocation6]   ;;  %s416_s12 = scalar_lea.hbm %s552_s1, 2048 }
  0x16   :  { %s31_s9 = sshll.u32 %s469_s8, 4  ;;  %p417_p8 = scmp.ne.s32.totalorder %s552_s1, %s416_s12  ;;  %s32_s9 = int_to_ptr.vmem [resolvable:$true] %s31_s9 }
  0x17   :  { %p420_p9 = scmp.lt.u32.totalorder %s416_s12, %s552_s1 }
  0x19   :  { %p422_p10 = pnand %p420_p9, %p417_p8 }
  0x1b   :  { %425 = shalt.err (!%p422_p10)
}
  0x1c   :  { %s426_s17 = scalar_lea.vmem %s32_s9, 2048  ;;  %p431_p12 = scmp.lt.s32.totalorder %s32_s9, %s32_s9 }
  0x1d   :  { %p427_p11 = scmp.ne.s32.totalorder %s32_s9, %s426_s17  ;;  %p432_p13 = scmp.lt.s32.totalorder %s426_s17, %s426_s17 }
  0x1f   :  { %p433_p0 = por %p432_p13, %p431_p12 }
  0x21   :  { %p434_p1 = pnand %p433_p0, %p427_p11 }
  0x23   :  { %437 = shalt.err (!%p434_p1)
}
  0x24   :  { %s470_s0 = smov 128   ;;  %s471_s18 = smov 8  }
  0x25   :  { %37 = dma.hbm_to_vmem [thread:$0]  %s552_s1, 2048, %s32_s9, [#allocation7], %s470_s0, %s470_s0, %s471_s18  }
  0x26   :  { %460 = dma.done.wait [#allocation4], 128  }
  0x27   :  { %461 = vsyncadd [#allocation4], 4294967168 }
  0x28   :  { %462 = dma.done.wait [#allocation7], 2048  }
  0x29   :  { %463 = vsyncadd [#allocation7], 4294965248  ;;  %v472_v0 = vmov 0.0|0.0   ;;  %vm473_vm0 = vmmov 0   ;;  %v474_v1 = vmov 0.0   ;;  %v51_v2 = vld [vmem:[#allocation6] sm:$0xff]  ;;  %v147_v33 = vstv %s555_s4 }
  0x2a   :  { %354 = vmatprep.subr.bf16.mxu0 %v472_v0  ;;  %346 = vmatprep.mubr.msk.f32.mxu0 %vm473_vm0, %v474_v1  ;;  %v52_v3 = vld [vmem:[#allocation6 + $0x8] sm:$0xff]  ;;  %v53_v4 = vld [vmem:[#allocation6 + $0x10] sm:$0xff]  ;;  %v54_v6 = vld [vmem:[#allocation6 + $0x18] sm:$0xff]  ;;  %v254_v41 = vlaneseq  ;;  %vm265_vm3 = vcmask 60416  }
  0x2b   :  { %349 = vmatprep.subr.mxu1 %v474_v1  ;;  %351 = vmatprep.mubr.msk.f32.mxu1 %vm473_vm0, %v474_v1  ;;  %v355_v5 = vpack.c.bf16 %v52_v3, %v51_v2  ;;  %v358_v7 = vpack.c.bf16 %v54_v6, %v53_v4  ;;  %v55_v8 = vld [vmem:[#allocation6 + $0x20] sm:$0xff]  ;;  %v56_v9 = vld [vmem:[#allocation6 + $0x28] sm:$0xff]  ;;  %v57_v11 = vld [vmem:[#allocation6 + $0x30] sm:$0xff] }
  0x2c   :  { %v361_v10 = vpack.c.bf16 %v56_v9, %v55_v8  ;;  %v58_v12 = vld [vmem:[#allocation6 + $0x38] sm:$0xff]  ;;  %v59_v14 = vld [vmem:[#allocation6 + $0x40] sm:$0xff]  ;;  %v60_v15 = vld [vmem:[#allocation6 + $0x48] sm:$0xff]  ;;  %v257_v43 = vand.u32 127, %v254_v41  ;;  %v255_v45 = vshrl.u32 %v254_v41, 7 }
  0x2d   :  { %356 = vmatpush3.bf16.msra.mxu0 %v355_v5  ;;  %v364_v13 = vpack.c.bf16 %v58_v12, %v57_v11  ;;  %v367_v16 = vpack.c.bf16 %v60_v15, %v59_v14  ;;  %v61_v17 = vld [vmem:[#allocation6 + $0x50] sm:$0xff]  ;;  %v62_v18 = vld [vmem:[#allocation6 + $0x58] sm:$0xff]  ;;  %v63_v20 = vld [vmem:[#allocation6 + $0x60] sm:$0xff] }
  0x2e   :  { %357 = vmatprep.subr.bf16.mxu0 %v472_v0  ;;  %v370_v19 = vpack.c.bf16 %v62_v18, %v61_v17  ;;  %v64_v21 = vld [vmem:[#allocation6 + $0x68] sm:$0xff]  ;;  %v65_v23 = vld [vmem:[#allocation6 + $0x70] sm:$0xff]  ;;  %v66_v24 = vld [vmem:[#allocation6 + $0x78] sm:$0xff]  ;;  %v261_v46 = vmul.u32 4, %v257_v43 }
  0x2f   :  { %v373_v22 = vpack.c.bf16 %v64_v21, %v63_v20  ;;  %v376_v25 = vpack.c.bf16 %v66_v24, %v65_v23  ;;  %v50_v26 = vld [vmem:[#allocation3] sm:$0xff] }
  0x30   :  { %v294_v27 = vld [vmem:[%s553_s2] ss:$0 sm:$0xff]  ;;  %v262_v49 = vadd.s32 %v261_v46, %v255_v45  ;;  %s475_s2 = smov [#allocation8]  }
  0x31   :  { %359 = vmatpush3.bf16.msra.mxu0 %v358_v7  ;;  %v145_v32 = vld [vmem:[%s554_s3] sm:$0xf]  ;;  %s284_s3 = sshll.u32 %s475_s2, 4  ;;  %s285_s3 = int_to_ptr.vmem [resolvable:$true] %s284_s3 }
  0x32   :  { %360 = vmatprep.subr.bf16.mxu0 %v472_v0  ;;  %vm263_vm2 = vcmp.lt.s32.totalorder %v262_v49, 16  ;;  %s438_s26 = scalar_lea.vmem %s285_s3, 16  ;;  %s442_s27 = scalar_lea.vmem %s285_s3, 32 }
  0x33   :  { %p439_p2 = scmp.ne.s32.totalorder %s285_s3, %s438_s26  ;;  %p443_p3 = scmp.lt.s32.totalorder %s285_s3, %s285_s3 }
  0x34   :  { %p444_p4 = scmp.lt.s32.totalorder %s442_s27, %s438_s26 }
  0x35   :  { %362 = vmatpush3.bf16.msra.mxu0 %v361_v10 }
  0x36   :  { %363 = vmatprep.subr.bf16.mxu0 %v472_v0  ;;  %p445_p5 = por %p444_p4, %p443_p3 }
  0x38   :  { %p446_p6 = pnand %p445_p5, %p439_p2 }
  0x39   :  { %365 = vmatpush3.bf16.msra.mxu0 %v364_v13 }
  0x3a   :  { %366 = vmatprep.subr.bf16.mxu0 %v472_v0 }
  0x3d   :  { %368 = vmatpush3.bf16.msra.mxu0 %v367_v16 }
  0x3e   :  { %369 = vmatprep.subr.bf16.mxu0 %v472_v0 }
  0x41   :  { %371 = vmatpush3.bf16.msra.mxu0 %v370_v19 }
  0x42   :  { %372 = vmatprep.subr.bf16.mxu0 %v472_v0 }
  0x45   :  { %374 = vmatpush3.bf16.msra.mxu0 %v373_v22 }
  0x46   :  { %375 = vmatprep.subr.bf16.mxu0 %v472_v0 }
  0x49   :  { %377 = vmatpush3.bf16.msra.mxu0 %v376_v25 }
  0x4c   :  { %347 = vmatmul.mubr.f32.vlgmr.msra.gmra.mrb[0].mxu0 %v50_v26 }
 0x11f   :  { %v140_v28 = vpop.f32.mrb[0].mxu0 }
 0x120   :  { %v141_v29 = vadd.f32 %v294_v27, %v140_v28  ;;  %v348_v30 = vpop.f32.mrb[1].mxu0 }
 0x122   :  { %v144_v31 = vmax.f32 %v141_v29, 0.0 }
 0x124   :  { %350 = vmatpush3.xpose.msra.mxu1 %v144_v31 }
 0x127   :  { %352 = vmatmul.mubr.f32.vlgmr.msra.gmra.mrb[0].mxu1 %v145_v32 }
 0x1fa   :  { %v214_v34 = vpop.f32.mrb[0].mxu1 }
 0x1fb   :  { %v215_v35 = vadd.f32 %v214_v34, %v147_v33  ;;  %v353_v36 = vpop.f32.mrb[1].mxu1 }
 0x1fd   :  { %v219_v37 = vand.u32 2147483647, %v215_v35  ;;  %v218_v53 = vmax.f32 %v215_v35, 0.0 }
 0x1ff   :  { %v220_v38 = vsub.f32 0.0, %v219_v37 }
 0x201   :  { %v221_v39 = vmul.f32 1.442695, %v220_v38 }
 0x203   :  { %390 = vpow2.f32 %v221_v39 }
 0x20d   :  { %v391_v40 = vpop.eup %390 }
 0x20e   :  { %v223_v42 = vadd.f32 1.0, %v391_v40  ;;  %v226_v44 = vmul.f32 -0.5, %v391_v40  ;;  %v229_v48 = vand.u32 2147483647, %v391_v40 }
 0x210   :  { %392 = vlog2.f32 %v223_v42  ;;  %v227_v47 = vadd.f32 1.0, %v226_v44  ;;  %vm230_vm1 = vcmp.lt.f32.partialorder %v229_v48, 0.0004427343 }
 0x212   :  { %v228_v52 = vmul.f32 %v391_v40, %v227_v47 }
 0x21a   :  { %v393_v50 = vpop.eup %392 }
 0x21b   :  { %v225_v51 = vmul.f32 0.6931472, %v393_v50 }
 0x21d   :  { %v231_v54 = vsel %vm230_vm1, %v228_v52, %v225_v51 }
 0x21e   :  { %v232_v55 = vadd.f32 %v231_v54, %v218_v53 }
 0x220   :  { %v264_v56 = vsel %vm263_vm2, %v232_v55, 0.0 }
 0x221   :  { %v266_v57 = vsel %vm265_vm3, %v264_v56, 0.0 }
 0x222   :  { %267 = vadd.xlane.f32.xlu0 %v266_v57 }
 0x2af   :  { %v268_v58 = vpop.xlane.xlu0 %267 }
 0x2b0   :  { %v269_v59 = vrot.slane %v268_v58, 4 }
 0x2b2   :  { %v270_v60 = vadd.f32 %v269_v59, %v268_v58 }
 0x2b4   :  { %v271_v61 = vrot.slane %v270_v60, 2 }
 0x2b6   :  { %v272_v62 = vadd.f32 %v271_v61, %v270_v60 }
 0x2b8   :  { %v273_v63 = vrot.slane %v272_v62, 1 }
 0x2ba   :  { %v274_v0 = vadd.f32 %v273_v63, %v272_v62 }
 0x2bc   :  { %378 = vpush %v274_v0 }
 0x2ed   :  { %s379_s4 = spop %378 }
 0x2ee   :  { %v276_v1 = vstv %s379_s4 }
 0x2ef   :  { %277 = vst [vmem:[#allocation8] sm:$0x1] %v276_v1 }
 0x2f0   :  { %449 = shalt.err (!%p446_p6)
}
 0x2f1   :  { %s450_s30 = scalar_lea.hbm %s556_s5, 16 }
 0x2f2   :  { %p451_p7 = scmp.ne.s32.totalorder %s556_s5, %s450_s30  ;;  %p454_p8 = scmp.lt.u32.totalorder %s450_s30, %s556_s5 }
 0x2f4   :  { %p456_p9 = pnand %p454_p8, %p451_p7 }
 0x2f6   :  { %459 = shalt.err (!%p456_p9)
}
 0x2f7   :  { %287 = dma.vmem_to_hbm [thread:$0]  %s285_s3, 16, %s556_s5, [#allocation5]  }
 0x2f8   :  { %464 = dma.done.wait [#allocation5], 16  }
 0x2f9   :  { %465 = vsyncadd [#allocation5], 4294967280 }
 0x2fa   :  { %291 = vsyncpa [#allocation4], 1 }
 0x2fb   :  { %292 = vsyncpa [#allocation7], 1 }
 0x2fc   :  { %293 = vsyncpa [#allocation5], 1 }

</bundles_post_ra>
